<compile_context>
chip_gen: v6e
topology: v6e:2x2x1
jax: 0.10.0
libtpu: 0.0.40
codegen_flags: <defaults>
</compile_context>

<pallas_src>
import math

import jax
import jax.numpy as jnp
from jax import lax
from jax.experimental import pallas as pl
from jax.experimental.pallas import tpu as pltpu


def _linear_kernel_single_k(x_ref, w_ref, b_ref, o_ref):
    """K fits in one tile: one MXU pass, bias add, store. No scratch, no gates."""
    # x: (bm, bk), w: (bn, bk) (PyTorch Linear layout: weight is (out, in)).
    # Contract the LAST dims of both operands so the weight "transpose" is
    # absorbed into the MXU operand feed instead of a materialized transpose.
    acc = lax.dot_general(
        x_ref[...], w_ref[...],
        dimension_numbers=(((1,), (1,)), ((), ())),
        preferred_element_type=jnp.float32)
    o_ref[...] = (acc + b_ref[...]).astype(o_ref.dtype)


def _linear_kernel_multi_k(x_ref, w_ref, b_ref, o_ref, acc_ref):
    """K reduced over the last ("arbitrary") grid axis into a VMEM accumulator."""
    k = pl.program_id(2)

    @pl.when(k == 0)
    def _():
        acc_ref[...] = jnp.zeros_like(acc_ref)

    acc_ref[...] += lax.dot_general(
        x_ref[...], w_ref[...],
        dimension_numbers=(((1,), (1,)), ((), ())),
        preferred_element_type=jnp.float32)

    @pl.when(k == pl.num_programs(2) - 1)
    def _():
        o_ref[...] = (acc_ref[...] + b_ref[...]).astype(o_ref.dtype)


def _round_up(x, m):
    return (x + m - 1) // m * m


def linear_final(x, weight, bias=None, *, bm=None, bn=None, bk=None):
    """y = F.linear(x, weight, bias) = x @ weight.T + bias.

    x: (..., in_features), weight: (out_features, in_features),
    bias: (out_features,) or None.
    """
    *lead, K = x.shape
    N, K_w = weight.shape
    assert K == K_w, "in_features mismatch between x and weight"

    x2 = x.reshape(-1, K)            # fold all batch dims into the sublane axis
    M = x2.shape[0]
    dtype = x.dtype

    # Tile sizes: lane axis in multiples of 128, sublane axis in multiples of
    # 8; capped at 512 so the f32 working set (x + W double-buffered, out
    # double-buffered, acc) stays ~7 MiB — well inside the scoped VMEM limit
    # on v5e/v6e/v7x — while still amortizing per-grid-step overhead.
    bm = bm or min(_round_up(max(M, 1), 8), 512)
    bn = bn or min(_round_up(max(N, 1), 128), 512)
    bk = bk or min(_round_up(max(K, 1), 128), 512)

    Mp, Np, Kp = _round_up(M, bm), _round_up(N, bn), _round_up(K, bk)

    # Zero-pad once in the wrapper (zeros in K contribute nothing; padded
    # rows/cols of the output are sliced off below). Skip when already aligned.
    xp = x2 if (Mp == M and Kp == K) else jnp.pad(x2, ((0, Mp - M), (0, Kp - K)))
    wp = weight if (Np == N and Kp == K) else jnp.pad(weight, ((0, Np - N), (0, Kp - K)))
    if bias is None:
        bp = jnp.zeros((1, Np), dtype)
    else:
        b2 = bias.reshape(1, N)
        bp = b2 if Np == N else jnp.pad(b2, ((0, 0), (0, Np - N)))

    n_k = Kp // bk

    if n_k == 1:
        # Fast path: no reduction axis, no accumulator scratch.
        out = pl.pallas_call(
            _linear_kernel_single_k,
            out_shape=jax.ShapeDtypeStruct((Mp, Np), dtype),
            grid_spec=pltpu.PrefetchScalarGridSpec(
                num_scalar_prefetch=0,
                grid=(Mp // bm, Np // bn),
                in_specs=[
                    pl.BlockSpec((bm, bk), lambda i, j: (i, 0)),   # x tile
                    pl.BlockSpec((bn, bk), lambda i, j: (j, 0)),   # W tile (out, in)
                    pl.BlockSpec((1, bn), lambda i, j: (0, j)),    # bias tile
                ],
                out_specs=pl.BlockSpec((bm, bn), lambda i, j: (i, j)),
            ),
            compiler_params=pltpu.CompilerParams(
                dimension_semantics=("parallel", "parallel")),
        )(xp, wp, bp)
    else:
        out = pl.pallas_call(
            _linear_kernel_multi_k,
            out_shape=jax.ShapeDtypeStruct((Mp, Np), dtype),
            grid_spec=pltpu.PrefetchScalarGridSpec(
                num_scalar_prefetch=0,
                grid=(Mp // bm, Np // bn, n_k),
                in_specs=[
                    pl.BlockSpec((bm, bk), lambda i, j, k: (i, k)),   # x tile
                    pl.BlockSpec((bn, bk), lambda i, j, k: (j, k)),   # W tile (out, in)
                    pl.BlockSpec((1, bn), lambda i, j, k: (0, j)),    # bias tile
                ],
                out_specs=pl.BlockSpec((bm, bn), lambda i, j, k: (i, j)),
                scratch_shapes=[pltpu.VMEM((bm, bn), jnp.float32)],
            ),
            compiler_params=pltpu.CompilerParams(
                dimension_semantics=("parallel", "parallel", "arbitrary")),
        )(xp, wp, bp)

    return out[:M, :N].reshape(*lead, N)


if __name__ == "__main__":
    key = jax.random.PRNGKey(0)
    B, S, IN_F, OUT_F = 2, 8, 32, 32

    kx, kw, kb = jax.random.split(key, 3)
    x = jax.random.normal(kx, (B, S, IN_F), jnp.float32)
    stdv = 1.0 / math.sqrt(IN_F)
    weight = jax.random.uniform(kw, (OUT_F, IN_F), jnp.float32,
                                minval=-stdv, maxval=stdv)
    bias = jax.random.uniform(kb, (OUT_F,), jnp.float32,
                              minval=-stdv, maxval=stdv)

    # Kernel with bias.
    y = linear_final(x, weight, bias)
    jax.block_until_ready(y)

    # Kernel without bias (register_parameter('bias', None) branch).
    y_nobias = linear_final(x, weight, None)
    jax.block_until_ready(y_nobias)

    # Exercise the multi-K (accumulator) path with a larger K to keep it tested.
    K_BIG = 1024
    kx2, kw2 = jax.random.split(kb, 2)
    x_big = jax.random.normal(kx2, (B, S, K_BIG), jnp.float32)
    w_big = jax.random.normal(kw2, (OUT_F, K_BIG), jnp.float32) * 0.02
    y_big = linear_final(x_big, w_big, bias, bk=512)
    jax.block_until_ready(y_big)

    # Pure-JAX reference check of F.linear semantics.
    ref = x @ weight.T + bias
    ref_nb = x @ weight.T
    ref_big = x_big @ w_big.T + bias
    assert y.shape == (B, S, OUT_F)
    assert y_nobias.shape == (B, S, OUT_F)
    assert y_big.shape == (B, S, OUT_F)
    assert jnp.allclose(y, ref, atol=1e-5, rtol=1e-5)
    assert jnp.allclose(y_nobias, ref_nb, atol=1e-5, rtol=1e-5)
    assert jnp.allclose(y_big, ref_big, atol=1e-3, rtol=1e-3)

    print("KERNEL_OK")
</pallas_src>

<mosaic_0001>
module attributes {stable_mosaic.version = 11 : i64} {
  func.func @_linear_kernel_single_k(%arg0: i32, %arg1: i32, %arg2: memref<16x128xf32, #tpu.memory_space<vmem>>, %arg3: memref<128x128xf32, #tpu.memory_space<vmem>>, %arg4: memref<1x128xf32, #tpu.memory_space<vmem>>, %arg5: memref<16x128xf32, #tpu.memory_space<vmem>>) attributes {dimension_semantics = [#tpu.dimension_semantics<parallel>, #tpu.dimension_semantics<parallel>], iteration_bounds = array<i64: 1, 1>, scalar_prefetch = 0 : i64, scratch_operands = 0 : i64, tpu.core_type = #tpu.core_type<tc>, window_params = [{transform_indices = @transform_0, window_bounds = array<i64: 16, 128>}, {transform_indices = @transform_1, window_bounds = array<i64: 128, 128>}, {transform_indices = @transform_2, window_bounds = array<i64: 1, 128>}, {transform_indices = @transform_3, window_bounds = array<i64: 16, 128>}]} {
    %c0 = arith.constant 0 : index
    %c0_0 = arith.constant 0 : index
    %0 = vector.load %arg2[%c0, %c0_0] : memref<16x128xf32, #tpu.memory_space<vmem>>, vector<16x128xf32>
    %c0_1 = arith.constant 0 : index
    %c0_2 = arith.constant 0 : index
    %1 = vector.load %arg3[%c0_1, %c0_2] : memref<128x128xf32, #tpu.memory_space<vmem>>, vector<128x128xf32>
    %cst = arith.constant dense<0.000000e+00> : vector<16x128xf32>
    %2 = tpu.matmul %0, %1, %cst {dimension_numbers = #tpu.dot_dimension_numbers<[1], [1], [0], [0], [0, 0, 1, 0], [], []>} : vector<16x128xf32>, vector<128x128xf32>, vector<16x128xf32> -> vector<16x128xf32>
    %c0_3 = arith.constant 0 : index
    %c0_4 = arith.constant 0 : index
    %3 = vector.load %arg4[%c0_3, %c0_4] : memref<1x128xf32, #tpu.memory_space<vmem>>, vector<1x128xf32>
    %4 = vector.broadcast %3 : vector<1x128xf32> to vector<16x128xf32>
    %5 = arith.addf %2, %4 : vector<16x128xf32>
    %c0_5 = arith.constant 0 : index
    %c0_6 = arith.constant 0 : index
    %6 = vector.load %arg5[%c0_5, %c0_6] : memref<16x128xf32, #tpu.memory_space<vmem>>, vector<16x128xf32>
    tpu.vector_store %arg5[%c0_5, %c0_6], %5 {strides = array<i32>} : memref<16x128xf32, #tpu.memory_space<vmem>>, vector<16x128xf32>,
    return
  }
  func.func @transform_0(%arg0: i32, %arg1: i32) -> (i32, i32) {
    %c0_i32 = arith.constant 0 : i32
    %c0_i32_0 = arith.constant 0 : i32
    return %arg0, %c0_i32 : i32, i32
  }
  func.func @transform_1(%arg0: i32, %arg1: i32) -> (i32, i32) {
    %c0_i32 = arith.constant 0 : i32
    %c0_i32_0 = arith.constant 0 : i32
    return %arg1, %c0_i32 : i32, i32
  }
  func.func @transform_2(%arg0: i32, %arg1: i32) -> (i32, i32) {
    %c0_i32 = arith.constant 0 : i32
    %c0_i32_0 = arith.constant 0 : i32
    return %c0_i32, %arg1 : i32, i32
  }
  func.func @transform_3(%arg0: i32, %arg1: i32) -> (i32, i32) {
    %c0_i32 = arith.constant 0 : i32
    return %arg0, %arg1 : i32, i32
  }
}

</mosaic_0001>

<bundles_post_ra>
// kernel: tpu_custom_call.1
= control target key start
LH: loop header
LB: loop body
LE: loop exit
PB: predicated region body
PF: predicated region fallthrough
CT: control target
= control target key end

     0   :  { %8 = vsyncpa [#allocation3], 0  ;;  %s334_s0 = inlined_call_operand.hbm [shape: f32[16,128], index: 0, kind: input, shape index: {}]   ;;  %s335_s1 = inlined_call_operand.hbm [shape: f32[128,128], index: 1, kind: input, shape index: {}]   ;;  %s336_s2 = inlined_call_operand.vmem [shape: f32[1,128], index: 2, kind: input, shape index: {}]   ;;  %s337_s3 = inlined_call_operand.hbm [shape: f32[16,128], index: 3, kind: output, shape index: {}]  }
   0x1   :  { %9 = vsyncpa [#allocation6], 0 }
   0x2   :  { %10 = vsyncpa [#allocation4], 0  ;;  %s288_s12 = smov [#allocation2]  }
   0x3   :  { %s16_s13 = sshll.u32 %s288_s12, 4  ;;  %s17_s13 = int_to_ptr.vmem [resolvable:$true] %s16_s13 }
   0x4   :  { %s230_s14 = scalar_lea.vmem %s17_s13, 256  ;;  %p235_p1 = scmp.lt.s32.totalorder %s17_s13, %s17_s13 }
   0x5   :  { %p231_p0 = scmp.ne.s32.totalorder %s17_s13, %s230_s14  ;;  %p236_p2 = scmp.lt.s32.totalorder %s230_s14, %s230_s14 }
   0x7   :  { %p237_p3 = por %p236_p2, %p235_p1 }
   0x9   :  { %p238_p4 = pnand %p237_p3, %p231_p0 }
   0xb   :  { %241 = shalt.err (!%p238_p4)
}
   0xc   :  { %s289_s15 = smov 128   ;;  %s290_s16 = smov 8  }
   0xd   :  { %22 = dma.hbm_to_vmem [thread:$0]  %s334_s0, 256, %s17_s13, [#allocation3], %s289_s15, %s289_s15, %s290_s16  }
   0xe   :  { %s291_s19 = smov [#allocation5]  }
   0xf   :  { %s28_s20 = sshll.u32 %s291_s19, 4  ;;  %s29_s20 = int_to_ptr.vmem [resolvable:$true] %s28_s20 }
  0x10   :  { %s250_s21 = scalar_lea.vmem %s29_s20, 2048  ;;  %p255_p6 = scmp.lt.s32.totalorder %s29_s20, %s29_s20 }
  0x11   :  { %p251_p5 = scmp.ne.s32.totalorder %s29_s20, %s250_s21  ;;  %p256_p7 = scmp.lt.s32.totalorder %s250_s21, %s250_s21 }
  0x13   :  { %p257_p8 = por %p256_p7, %p255_p6 }
  0x15   :  { %p258_p9 = pnand %p257_p8, %p251_p5 }
  0x17   :  { %261 = shalt.err (!%p258_p9)
}
  0x18   :  { %34 = dma.hbm_to_vmem [thread:$0]  %s335_s1, 2048, %s29_s20, [#allocation6], %s289_s15, %s289_s15, %s290_s16  }
  0x19   :  { %282 = dma.done.wait [#allocation3], 256  }
  0x1a   :  { %283 = vsyncadd [#allocation3], 4294967040 }
  0x1b   :  { %284 = dma.done.wait [#allocation6], 2048  }
  0x1c   :  { %285 = vsyncadd [#allocation6], 4294965248  ;;  %v60_v0 = vld [vmem:[#allocation5 + $0x78] sm:$0xff]  ;;  %v59_v1 = vld [vmem:[#allocation5 + $0x70] sm:$0xff]  ;;  %s292_s24 = smov [#allocation7]  }
  0x1d   :  { %182 = vmatprep.subr.mxu0 %v60_v0  ;;  %v58_v2 = vld [vmem:[#allocation5 + $0x68] sm:$0xff]  ;;  %v43_v3 = vld [vmem:[#allocation2] sm:$0xff]  ;;  %v57_v4 = vld [vmem:[#allocation5 + $0x60] sm:$0xff]  ;;  %s150_s25 = sshll.u32 %s292_s24, 4  ;;  %s151_s25 = int_to_ptr.vmem [resolvable:$true] %s150_s25 }
  0x1e   :  { %183 = vmatpush3.xpose.msra.mxu0 %v60_v0  ;;  %214 = vmatprep.mubr.f32.mxu0 %v43_v3  ;;  %v56_v5 = vld [vmem:[#allocation5 + $0x58] sm:$0xff]  ;;  %v55_v6 = vld [vmem:[#allocation5 + $0x50] sm:$0xff]  ;;  %v54_v7 = vld [vmem:[#allocation5 + $0x48] sm:$0xff]  ;;  %s262_s26 = scalar_lea.vmem %s151_s25, 256  ;;  %p267_p11 = scmp.lt.s32.totalorder %s151_s25, %s151_s25 }
  0x1f   :  { %184 = vmatprep.subr.mxu0 %v59_v1  ;;  %v53_v8 = vld [vmem:[#allocation5 + $0x40] sm:$0xff]  ;;  %v52_v9 = vld [vmem:[#allocation5 + $0x38] sm:$0xff]  ;;  %v51_v10 = vld [vmem:[#allocation5 + $0x30] sm:$0xff]  ;;  %p263_p10 = scmp.ne.s32.totalorder %s151_s25, %s262_s26  ;;  %p268_p12 = scmp.lt.s32.totalorder %s262_s26, %s262_s26 }
  0x20   :  { %v50_v11 = vld [vmem:[#allocation5 + $0x28] sm:$0xff]  ;;  %v49_v12 = vld [vmem:[#allocation5 + $0x20] sm:$0xff]  ;;  %v48_v13 = vld [vmem:[#allocation5 + $0x18] sm:$0xff] }
  0x21   :  { %v47_v14 = vld [vmem:[#allocation5 + $0x10] sm:$0xff]  ;;  %v46_v15 = vld [vmem:[#allocation5 + $0x8] sm:$0xff]  ;;  %v45_v16 = vld [vmem:[#allocation5] sm:$0xff]  ;;  %p269_p13 = por %p268_p12, %p267_p11 }
  0x22   :  { %185 = vmatpush3.xpose.msra.mxu0 %v59_v1  ;;  %v44_v17 = vld [vmem:[#allocation2 + $0x8] sm:$0xff]  ;;  %v163_v18 = vld [vmem:[%s336_s2] ss:$0 sm:$0xff] }
  0x23   :  { %186 = vmatprep.subr.mxu0 %v58_v2  ;;  %p270_p0 = pnand %p269_p13, %p263_p10 }
  0x26   :  { %187 = vmatpush3.xpose.msra.mxu0 %v58_v2 }
  0x27   :  { %188 = vmatprep.subr.mxu0 %v57_v4 }
  0x2a   :  { %189 = vmatpush3.xpose.msra.mxu0 %v57_v4 }
  0x2b   :  { %190 = vmatprep.subr.mxu0 %v56_v5 }
  0x2e   :  { %191 = vmatpush3.xpose.msra.mxu0 %v56_v5 }
  0x2f   :  { %192 = vmatprep.subr.mxu0 %v55_v6 }
  0x32   :  { %193 = vmatpush3.xpose.msra.mxu0 %v55_v6 }
  0x33   :  { %194 = vmatprep.subr.mxu0 %v54_v7 }
  0x36   :  { %195 = vmatpush3.xpose.msra.mxu0 %v54_v7 }
  0x37   :  { %196 = vmatprep.subr.mxu0 %v53_v8 }
  0x3a   :  { %197 = vmatpush3.xpose.msra.mxu0 %v53_v8 }
  0x3b   :  { %198 = vmatprep.subr.mxu0 %v52_v9 }
  0x3e   :  { %199 = vmatpush3.xpose.msra.mxu0 %v52_v9 }
  0x3f   :  { %200 = vmatprep.subr.mxu0 %v51_v10 }
  0x42   :  { %201 = vmatpush3.xpose.msra.mxu0 %v51_v10 }
  0x43   :  { %202 = vmatprep.subr.mxu0 %v50_v11 }
  0x46   :  { %203 = vmatpush3.xpose.msra.mxu0 %v50_v11 }
  0x47   :  { %204 = vmatprep.subr.mxu0 %v49_v12 }
  0x4a   :  { %205 = vmatpush3.xpose.msra.mxu0 %v49_v12 }
  0x4b   :  { %206 = vmatprep.subr.mxu0 %v48_v13 }
  0x4e   :  { %207 = vmatpush3.xpose.msra.mxu0 %v48_v13 }
  0x4f   :  { %208 = vmatprep.subr.mxu0 %v47_v14 }
  0x52   :  { %209 = vmatpush3.xpose.msra.mxu0 %v47_v14 }
  0x53   :  { %210 = vmatprep.subr.mxu0 %v46_v15 }
  0x56   :  { %211 = vmatpush3.xpose.msra.mxu0 %v46_v15 }
  0x57   :  { %212 = vmatprep.subr.mxu0 %v45_v16 }
  0x5a   :  { %213 = vmatpush3.xpose.msra.mxu0 %v45_v16 }
  0x5d   :  { %215 = vmatmul.mubr.f32.vlgmr.msra.gmra.mxu0 %v44_v17 }
 0x11d   :  { %v216_v19 = vpop.f32.mrf.mxu0 }
 0x11e   :  { %v140_v20 = vadd.f32 %v216_v19, %v163_v18 }
 0x11f   :  { %v134_v21 = vpop.f32.mrf.mxu0 }
 0x120   :  { %144 = vst [vmem:[#allocation7 + $0x8] sm:$0xff] %v140_v20  ;;  %v135_v22 = vadd.f32 %v163_v18, %v134_v21 }
 0x122   :  { %143 = vst [vmem:[#allocation7] sm:$0xff] %v135_v22 }
 0x123   :  { %273 = shalt.err (!%p270_p0)
}
 0x124   :  { %156 = dma.vmem_to_hbm [thread:$0]  %s151_s25, 256, %s337_s3, [#allocation4], %s289_s15, %s289_s15, %s290_s16  }
 0x125   :  { %286 = dma.done.wait [#allocation4], 256  }
 0x126   :  { %287 = vsyncadd [#allocation4], 4294967040 }
 0x127   :  { %160 = vsyncpa [#allocation3], 1 }
 0x128   :  { %161 = vsyncpa [#allocation6], 1 }
 0x129   :  { %162 = vsyncpa [#allocation4], 1 }

</bundles_post_ra>
